<compile_context>
chip_gen: v7x
topology: tpu7x:2x2x1
jax: 0.10.0
libtpu: 0.0.40
codegen_flags: <defaults>
</compile_context>

<pallas_src>
import jax
import jax.numpy as jnp
from jax.experimental import pallas as pl
from jax.experimental.pallas import tpu as pltpu

_POSE_DIM = 144      # 24 joints x 6D rotation
_NUM_BETAS = 10
_LANE = 128


def _round_up(x, m):
    return (x + m - 1) // m * m


def _fc_head_beta_kernel(hfeat_ref, pose_ref, w1p_ref, w2_ref, bias2_ref, o_ref):
    """One (batch-row, sample-tile) step: o = relu(pose @ W1p + hfeat) @ W2 + bias."""
    pose = pose_ref[0]                                           # (TS, 144) bf16
    h = jnp.dot(pose, w1p_ref[...], preferred_element_type=jnp.float32)
    h = h + hfeat_ref[0]                                         # + (feats @ W1f + b1), f32
    h = jnp.maximum(h, 0.0)                                      # ReLU on f32 accumulator
    o = jnp.dot(h.astype(w2_ref.dtype), w2_ref[...],
                preferred_element_type=jnp.float32)
    o_ref[0] = (o + bias2_ref[...]).astype(o_ref.dtype)          # (TS, 10) contiguous store


def pack_fc_head_beta_params(params, fc_head_inchannel, *, compute_dtype=jnp.bfloat16):
    """One-time layout prep (call once, NOT per forward): split W1 into feats /
    pose halves, zero-pad the hidden dim to a lane multiple, cast the streamed
    weights to bf16, and fold b2 + init_betas into a single bias."""
    w1, b1, w2, b2, init_betas = (params["w1"], params["b1"], params["w2"],
                                  params["b2"], params["init_betas"])
    C = fc_head_inchannel
    H = w1.shape[1]
    Hp = _round_up(H, _LANE)
    w1f = jnp.zeros((C, Hp), jnp.float32).at[:, :H].set(w1[:C])              # stays f32 (XLA GEMM)
    b1p = jnp.zeros((1, Hp), jnp.float32).at[0, :H].set(b1)
    w1p = jnp.zeros((_POSE_DIM, Hp), jnp.float32).at[:, :H].set(w1[C:]).astype(compute_dtype)
    w2p = jnp.zeros((Hp, _NUM_BETAS), jnp.float32).at[:H].set(w2).astype(compute_dtype)
    bias2 = (b2 + init_betas).reshape(1, _NUM_BETAS).astype(jnp.float32)
    return {"w1f": w1f, "b1": b1p, "w1p": w1p, "w2": w2p, "bias2": bias2}


def fc_head_beta_forward(feats, pred_pose, packed, *, sample_tile=1024,
                         vmem_limit_bytes=48 * 1024 * 1024):
    """feats: (B, C) f32, pred_pose: (B, S, 144) f32 -> pred_betas (B, S, 10) f32."""
    B, C = feats.shape
    S = pred_pose.shape[1]
    assert pred_pose.shape == (B, S, _POSE_DIM)
    Hp = packed["w1p"].shape[1]
    compute_dtype = packed["w1p"].dtype

    # Feats half of layer 1, batched over all B rows in one XLA GEMM (full MXU
    # M-utilization), kept in f32.  The Pallas kernel then only streams pose.
    hfeat = (feats @ packed["w1f"] + packed["b1"]).reshape(B, 1, Hp)          # (B, 1, Hp) f32
    pose = pred_pose.astype(compute_dtype)

    # Large sample tile (multiple of 16 for bf16 sublane packing) amortizes the
    # ~0.35us per-grid-step overhead; cdiv grid handles ragged S.  At TS=1024
    # and Hp<=2048 the working set is well under v7x's 64 MiB VMEM.
    TS = S if S <= sample_tile else sample_tile
    grid = (B, pl.cdiv(S, TS))
    # TODO(synk): for tiny S (e.g. S=2 training) also tile over batch rows so
    # each grid step processes >= ~1024 rows instead of grid=(B, 1).

    out = pl.pallas_call(
        _fc_head_beta_kernel,
        out_shape=jax.ShapeDtypeStruct((B, S, _NUM_BETAS), jnp.float32),
        grid_spec=pltpu.PrefetchScalarGridSpec(
            num_scalar_prefetch=0,
            grid=grid,
            in_specs=[
                pl.BlockSpec((1, 1, Hp), lambda b, j: (b, 0, 0)),            # hfeat row (f32)
                pl.BlockSpec((1, TS, _POSE_DIM), lambda b, j: (b, j, 0)),    # pose stream (bf16)
                pl.BlockSpec((_POSE_DIM, Hp), lambda b, j: (0, 0)),          # W1 pose half
                pl.BlockSpec((Hp, _NUM_BETAS), lambda b, j: (0, 0)),         # W2
                pl.BlockSpec((1, _NUM_BETAS), lambda b, j: (0, 0)),          # b2 + init_betas
            ],
            out_specs=pl.BlockSpec((1, TS, _NUM_BETAS), lambda b, j: (b, j, 0)),
        ),
        compiler_params=pltpu.CompilerParams(
            dimension_semantics=("parallel", "parallel"),
            vmem_limit_bytes=vmem_limit_bytes,
        ),
    )(hfeat, pose, packed["w1p"], packed["w2"], packed["bias2"])
    return out


def make_params(key, fc_head_inchannel, num_features):
    """Deterministic synthetic parameters matching FCHeadBeta.__init__ shapes."""
    in_channel = fc_head_inchannel + _POSE_DIM
    k1, k2, k3, k4, k5 = jax.random.split(key, 5)

    # Layer 0: default PyTorch Linear init (uniform suffices for a synthetic check).
    lim1 = 1.0 / jnp.sqrt(in_channel)
    w1 = jax.random.uniform(k1, (in_channel, num_features), jnp.float32, -lim1, lim1)
    b1 = jax.random.uniform(k2, (num_features,), jnp.float32, -lim1, lim1)

    # Layer 2: xavier_uniform_(gain=0.02) on weight; bias default uniform.
    xav = 0.02 * jnp.sqrt(6.0 / (num_features + _NUM_BETAS))
    w2 = jax.random.uniform(k3, (num_features, _NUM_BETAS), jnp.float32, -xav, xav)
    lim2 = 1.0 / jnp.sqrt(num_features)
    b2 = jax.random.uniform(k4, (_NUM_BETAS,), jnp.float32, -lim2, lim2)

    # init_betas buffer: synthetic stand-in for mean_params['shape'] (10,).
    init_betas = 0.1 * jax.random.normal(k5, (_NUM_BETAS,), jnp.float32)

    return {"w1": w1, "b1": b1, "w2": w2, "b2": b2, "init_betas": init_betas}


if __name__ == "__main__":
    key = jax.random.PRNGKey(0)
    kp, kf, kpose = jax.random.split(key, 3)

    batch = 2
    num_samples = 8
    fc_head_inchannel = 32     # backbone feature width (small synthetic)
    num_features = 64          # cfg.MODEL.FC_HEAD.NUM_FEATURES (small synthetic)

    params = make_params(kp, fc_head_inchannel, num_features)
    packed = pack_fc_head_beta_params(params, fc_head_inchannel)   # one-time weight prep
    feats = jax.random.normal(kf, (batch, fc_head_inchannel), jnp.float32)
    pred_pose = jax.random.normal(kpose, (batch, num_samples, _POSE_DIM), jnp.float32)

    pred_betas = fc_head_beta_forward(feats, pred_pose, packed)
    jax.block_until_ready(pred_betas)

    # Reference in plain JAX: same math as the PyTorch module, mirroring the
    # kernel's precision (f32 feats-GEMM; bf16 pose/hidden matmuls, f32 acc).
    B, C = feats.shape
    S = pred_pose.shape[1]
    rb = lambda a: a.astype(jnp.bfloat16).astype(jnp.float32)
    hfeat_ref = feats @ params["w1"][:C] + params["b1"]                       # (B, H) f32
    hpose_ref = jnp.einsum("bsk,kh->bsh", rb(pred_pose), rb(params["w1"][C:]),
                           preferred_element_type=jnp.float32)
    h = jnp.maximum(hfeat_ref[:, None, :] + hpose_ref, 0.0)
    ref = (jnp.einsum("bsh,ho->bso", rb(h), rb(params["w2"]),
                      preferred_element_type=jnp.float32)
           + params["b2"] + params["init_betas"])

    assert pred_betas.shape == (batch, num_samples, _NUM_BETAS)
    err = float(jnp.max(jnp.abs(pred_betas - ref)))
    assert jnp.allclose(pred_betas, ref, atol=1e-3, rtol=1e-3), err

    print("KERNEL_OK")
</pallas_src>

<mosaic_0001>
module attributes {stable_mosaic.version = 11 : i64} {
  func.func @_fc_head_beta_kernel(%arg0: i32, %arg1: i32, %arg2: memref<1x1x128xf32, #tpu.memory_space<vmem>>, %arg3: memref<1x8x144xbf16, #tpu.memory_space<vmem>>, %arg4: memref<144x128xbf16, #tpu.memory_space<vmem>>, %arg5: memref<128x10xbf16, #tpu.memory_space<vmem>>, %arg6: memref<1x10xf32, #tpu.memory_space<vmem>>, %arg7: memref<1x8x10xf32, #tpu.memory_space<vmem>>) attributes {dimension_semantics = [#tpu.dimension_semantics<parallel>, #tpu.dimension_semantics<parallel>], iteration_bounds = array<i64: 2, 1>, scalar_prefetch = 0 : i64, scratch_operands = 0 : i64, tpu.core_type = #tpu.core_type<tc>, window_params = [{transform_indices = @transform_0, window_bounds = array<i64: 1, 1, 128>}, {transform_indices = @transform_1, window_bounds = array<i64: 1, 8, 144>}, {pipeline_mode = #tpu.pipeline_mode<synchronous>, transform_indices = @transform_2, window_bounds = array<i64: 144, 128>}, {pipeline_mode = #tpu.pipeline_mode<synchronous>, transform_indices = @transform_3, window_bounds = array<i64: 128, 10>}, {pipeline_mode = #tpu.pipeline_mode<synchronous>, transform_indices = @transform_4, window_bounds = array<i64: 1, 10>}, {transform_indices = @transform_5, window_bounds = array<i64: 1, 8, 10>}]} {
    %c0 = arith.constant 0 : index
    %c0_0 = arith.constant 0 : index
    %c0_1 = arith.constant 0 : index
    %0 = vector.load %arg3[%c0, %c0_0, %c0_1] : memref<1x8x144xbf16, #tpu.memory_space<vmem>>, vector<1x8x144xbf16>
    %1 = vector.shape_cast %0 : vector<1x8x144xbf16> to vector<8x144xbf16>
    %c0_2 = arith.constant 0 : index
    %c0_3 = arith.constant 0 : index
    %2 = vector.load %arg4[%c0_2, %c0_3] : memref<144x128xbf16, #tpu.memory_space<vmem>>, vector<144x128xbf16>
    %cst = arith.constant dense<0.000000e+00> : vector<8x128xf32>
    %3 = tpu.matmul %1, %2, %cst {dimension_numbers = #tpu.dot_dimension_numbers<[1], [0], [0], [1], [0, 0, 1, 1], [], []>} : vector<8x144xbf16>, vector<144x128xbf16>, vector<8x128xf32> -> vector<8x128xf32>
    %c0_4 = arith.constant 0 : index
    %c0_5 = arith.constant 0 : index
    %c0_6 = arith.constant 0 : index
    %4 = vector.load %arg2[%c0_4, %c0_5, %c0_6] : memref<1x1x128xf32, #tpu.memory_space<vmem>>, vector<1x1x128xf32>
    %5 = vector.shape_cast %4 : vector<1x1x128xf32> to vector<1x128xf32>
    %6 = vector.broadcast %5 : vector<1x128xf32> to vector<8x128xf32>
    %7 = arith.addf %3, %6 : vector<8x128xf32>
    %cst_7 = arith.constant 0.000000e+00 : f32
    %8 = vector.broadcast %cst_7 : f32 to vector<8x128xf32>
    %9 = arith.maximumf %7, %8 : vector<8x128xf32>
    %10 = arith.truncf %9 : vector<8x128xf32> to vector<8x128xbf16>
    %c0_8 = arith.constant 0 : index
    %c0_9 = arith.constant 0 : index
    %11 = vector.load %arg5[%c0_8, %c0_9] : memref<128x10xbf16, #tpu.memory_space<vmem>>, vector<128x10xbf16>
    %cst_10 = arith.constant dense<0.000000e+00> : vector<8x10xf32>
    %12 = tpu.matmul %10, %11, %cst_10 {dimension_numbers = #tpu.dot_dimension_numbers<[1], [0], [0], [1], [0, 0, 1, 1], [], []>} : vector<8x128xbf16>, vector<128x10xbf16>, vector<8x10xf32> -> vector<8x10xf32>
    %c0_11 = arith.constant 0 : index
    %c0_12 = arith.constant 0 : index
    %13 = vector.load %arg6[%c0_11, %c0_12] : memref<1x10xf32, #tpu.memory_space<vmem>>, vector<1x10xf32>
    %14 = vector.broadcast %13 : vector<1x10xf32> to vector<8x10xf32>
    %15 = arith.addf %12, %14 : vector<8x10xf32>
    %c0_13 = arith.constant 0 : index
    %c0_14 = arith.constant 0 : index
    %c0_15 = arith.constant 0 : index
    %16 = vector.load %arg7[%c0_13, %c0_14, %c0_15] : memref<1x8x10xf32, #tpu.memory_space<vmem>>, vector<1x8x10xf32>
    %17 = vector.shape_cast %16 : vector<1x8x10xf32> to vector<8x10xf32>
    %18 = vector.shape_cast %15 : vector<8x10xf32> to vector<1x8x10xf32>
    tpu.vector_store %arg7[%c0_13, %c0_14, %c0_15], %18 {strides = array<i32>} : memref<1x8x10xf32, #tpu.memory_space<vmem>>, vector<1x8x10xf32>,
    return
  }
  func.func @transform_0(%arg0: i32, %arg1: i32) -> (i32, i32, i32) {
    %c0_i32 = arith.constant 0 : i32
    %c0_i32_0 = arith.constant 0 : i32
    %c0_i32_1 = arith.constant 0 : i32
    return %arg0, %c0_i32, %c0_i32_0 : i32, i32, i32
  }
  func.func @transform_1(%arg0: i32, %arg1: i32) -> (i32, i32, i32) {
    %c0_i32 = arith.constant 0 : i32
    %c0_i32_0 = arith.constant 0 : i32
    return %arg0, %arg1, %c0_i32 : i32, i32, i32
  }
  func.func @transform_2(%arg0: i32, %arg1: i32) -> (i32, i32) {
    %c0_i32 = arith.constant 0 : i32
    %c0_i32_0 = arith.constant 0 : i32
    %c0_i32_1 = arith.constant 0 : i32
    return %c0_i32, %c0_i32_0 : i32, i32
  }
  func.func @transform_3(%arg0: i32, %arg1: i32) -> (i32, i32) {
    %c0_i32 = arith.constant 0 : i32
    %c0_i32_0 = arith.constant 0 : i32
    %c0_i32_1 = arith.constant 0 : i32
    return %c0_i32, %c0_i32_0 : i32, i32
  }
  func.func @transform_4(%arg0: i32, %arg1: i32) -> (i32, i32) {
    %c0_i32 = arith.constant 0 : i32
    %c0_i32_0 = arith.constant 0 : i32
    %c0_i32_1 = arith.constant 0 : i32
    return %c0_i32, %c0_i32_0 : i32, i32
  }
  func.func @transform_5(%arg0: i32, %arg1: i32) -> (i32, i32, i32) {
    %c0_i32 = arith.constant 0 : i32
    %c0_i32_0 = arith.constant 0 : i32
    return %arg0, %arg1, %c0_i32 : i32, i32, i32
  }
}

</mosaic_0001>

<bundles_post_ra>
// kernel: tpu_custom_call.1
= control target key start
LH: loop header
LB: loop body
LE: loop exit
PB: predicated region body
PF: predicated region fallthrough
CT: control target
= control target key end

     0   :  { %10 = vsyncpa [#allocation3], 0  ;;  %s1159_s0 = inlined_call_operand.vmem [shape: f32[2,1,128], index: 0, kind: input, shape index: {}]   ;;  %s1160_s1 = inlined_call_operand.hbm [shape: bf16[2,8,144], index: 1, kind: input, shape index: {}]   ;;  %s1161_s2 = inlined_call_operand.vmem [shape: bf16[144,128], index: 2, kind: input, shape index: {}]   ;;  %s1162_s3 = inlined_call_operand.vmem [shape: bf16[128,10], index: 3, kind: input, shape index: {}]   ;;  %s1163_s4 = inlined_call_operand.vmem [shape: f32[1,10], index: 4, kind: input, shape index: {}]   ;;  %s1164_s5 = inlined_call_operand.hbm [shape: f32[2,8,10], index: 5, kind: output, shape index: {}]  }
   0x1   :  { %12 = vsyncpa [#allocation3 + $0x1], 0 }
   0x2   :  { %13 = vsyncpa [#allocation4], 0 }
   0x3   :  { %15 = vsyncpa [#allocation4 + $0x1], 0  ;;  %s924_s18 = smov 0   ;;  %s926_s19 = smov 0  }
   0x4   :  { %s928_s20 = smov 0   ;;  %s930_s21 = smov 0  }
   0x5   :  { %s932_s22 = smov 0   ;;  %s934_s23 = smov 0  }
   0x6 LB: > { %s625_s24 = sadd.s32 4294967295, %s887_s23   ;;  %s626_s25 = sadd.s32 4294967294, %s887_s23   ;;  %s887_s23 = sphi %s934_s23, %s21_s23   ;;  %s883_s22 = sphi %s932_s22, %s1180_s22   ;;  %s879_s21 = sphi %s930_s21, %s1179_s21   ;;  %s875_s20 = sphi %s928_s20, %s1178_s20   ;;  %s871_s19 = sphi %s926_s19, %s1177_s19   ;;  %s867_s18 = sphi %s924_s18, %s1176_s18  }
   0x7   : > { %s33_s26 = sadd.s32 1, %s883_s22  ;;  %s68_s27 = sadd.s32 1, %s875_s20 }
   0x8   : > { %p35_p0 = scmp.ge.s32.totalorder %s33_s26, 2  ;;  %p75_p1 = scmp.ne.s32.totalorder %s875_s20, %s871_s19 }
   0x9   : > { %p76_p2 = scmp.eq.s32.totalorder %s887_s23, 0  ;;  %p81_p3 = scmp.ne.s32.totalorder %s871_s19, %s867_s18 }
   0xa   : > { %s1182_s26 = smov (%p35_p0, %s33_s26), 0  ;;  %p82_p5 = scmp.eq.s32.totalorder %s625_s24, 0 }
   0xb   : > { %p965_p4 = por %p76_p2, %p75_p1  ;;  %s63_s29 = ssub.s32 %s883_s22, %s1182_s26 }
   0xc   : > { %p170_p6 = scmp.eq.s32.totalorder %s625_s24, 1  ;;  %p66_p7 = scmp.eq.s32.totalorder %s63_s29, 0 }
   0xd   : > { %p971_p8 = por %p82_p5, %p81_p3  ;;  %p176_p10 = scmp.eq.s32.totalorder %s626_s25, 1 }
   0xe   : > { %p975_p9 = por %p170_p6, %p75_p1  ;;  %p703_p13 = scmp.lt.s32.totalorder %s887_s23, 2 }
   0xf   : > { %s980_s7 = scalar_select %p66_p7, %s875_s20, %s68_s27  }
  0x10   : > { %s1168_s6 = scalar_select %p975_p9, 1, 0 }
  0x11   : > { %p982_p11 = por %p176_p10, %p81_p3  ;;  %s211_s9 = sand.u32 1, %s875_s20  }
  0x12   : > { %s629_s10 = sshll.u32 %s211_s9, 3  ;;  %s661_s11 = sshll.u32 %s883_s22, 7 }
  0x13   : > { %s1169_s8 = scalar_select %p982_p11, 1, 0 }
  0x14   : > { %s993_s14 = scalar_lea.hbm %s1160_s1, %s661_s11  ;;  %s215_s15 = scalar_lea.vmem [#allocation2], %s629_s10 }
  0x15   : > { %s225_s16 = sshll.u32 %s215_s15, 4  ;;  %p999_p0 = pnand %p703_p13, %p965_p4  ;;  %s995_s16 = int_to_ptr.vmem [resolvable:$true] %s225_s16 }
  0x16   : > { %s212_s24 = scalar_lea.sflag [#allocation3], %s211_s9  ;;  %s775_s25 = scalar_lea.hbm %s993_s14, 128 }
  0x17   : > { %p776_p3 = scmp.ne.s32.totalorder %s993_s14, %s775_s25  ;;  %p777_p5 = pneg %p999_p0 }
  0x18   : > { %s780_s28 = scalar_lea.hbm %s1160_s1, 256  ;;  %p781_p4 = scmp.lt.u32.totalorder %s993_s14, %s1160_s1 }
  0x19   : > { %p778_p6 = pnand %p777_p5, %p776_p3  ;;  %p782_p10 = scmp.lt.u32.totalorder %s780_s28, %s775_s25 }
  0x1a   : > { %p784_p12 = scmp.lt.u32.totalorder %s775_s25, %s993_s14 }
  0x1b   : > { %p779_p7 = pneg %p778_p6  ;;  %p783_p13 = por %p782_p10, %p781_p4 }
  0x1d   : > { %p785_p1 = por %p784_p12, %p783_p13 }
  0x1f   : > { %p786_p2 = pnand %p785_p1, %p779_p7 }
  0x21   : > { %789 = shalt.err (!%p786_p2)
}
  0x22   : > { %s790_s9 = scalar_lea.vmem %s995_s16, 128  ;;  %s889_s12 = smov [#allocation2]  }
  0x23   : > { %p791_p3 = scmp.ne.s32.totalorder %s995_s16, %s790_s9  ;;  %s795_s13 = sshll.u32 %s889_s12, 4  ;;  %s796_s13 = int_to_ptr.vmem [resolvable:$false] %s795_s13 }
  0x24   : > { %s797_s15 = scalar_lea.vmem %s796_s13, 256  ;;  %p798_p9 = scmp.lt.s32.totalorder %s995_s16, %s796_s13 }
  0x25   : > { %p793_p6 = pnand %p791_p3, %p777_p5  ;;  %p799_p4 = scmp.lt.s32.totalorder %s797_s15, %s790_s9 }
  0x27   : > { %p794_p11 = pneg %p793_p6  ;;  %p800_p10 = por %p799_p4, %p798_p9 }
  0x29   : > { %p801_p12 = pnand %p800_p10, %p794_p11 }
  0x2b   : > { %804 = shalt.err (!%p801_p12)
}
  0x2c   : > { %698 = dma.hbm_to_vmem [thread:$0]  (!%p999_p0), %s993_s14, 128, %s995_s16, %s212_s24  }
  0x2d   : > { %p1171_p1 = scmp.lt.s32.totalorder %s887_s23, 3  ;;  %p1172_p2 = scmp.ge.s32.totalorder %s887_s23, 1 }
  0x2f   : > { %p231_p5 = pnand %p1172_p2, %p1171_p1 }
  0x30   : > { %s1035_s25 = sand.u32 (!%p231_p5), 1, %s871_s19  }
  0x31   : > { %234 = sbr.rel (%p231_p5) target bundleno = 540 (0x21c), region = 40  ;;  %s633_s27 = sshll.u32 (!%p231_p5), %s1035_s25, 3 }
  0x32   : > { %s237_s29 = scalar_lea.sflag (!%p231_p5), [#allocation3], %s1035_s25  ;;  %s240_s17 = scalar_lea.vmem (!%p231_p5), [#allocation2], %s633_s27 }
  0x38   : > { %858 = dma.done.wait (%p971_p8), %s237_s29, 128  }
  0x39   : > { %860 = vsyncadd (%p971_p8), %s237_s29, 4294967168  ;;  %v890_v0 = vmov 0   ;;  %v891_v1 = vmov 0.0   ;;  %v756_v2 = vld [vmem:[%s1161_s2] sm:$0xff]   ;;  %v757_v3 = vld [vmem:[%s1161_s2 + $0x8] sm:$0xff]   ;;  %vm360_vm0 = vcmask 130048  }
  0x3a   : > { %364 = vmatprep.subr.bf16.mxu0 %v890_v0  ;;  %671 = vmatprep.subr.bf16.mxu1 %v891_v1  ;;  %v758_v4 = vld [vmem:[%s1161_s2 + $0x10] sm:$0xff]   ;;  %v759_v5 = vld [vmem:[%s1161_s2 + $0x18] sm:$0xff]   ;;  %v274_v6 = vld [vmem:[%s240_s17] sm:$0xff]  ;;  %vm892_vm1 = vmmov 0   ;;  %p270_p8 = scmp.lt.s32.totalorder %s879_s21, 1  ;;  %s658_s17 = sshll.u32 %s879_s21, 7 }
  0x3b   : > { %365 = vmatpush1.bf16.msra.mxu0 %v756_v2  ;;  %v637_v7 = vcombine.high %v274_v6, %v274_v6  ;;  %v767_v8 = vld [vmem:[%s1162_s3] sm:$0xff]   ;;  %v768_v9 = vld [vmem:[%s1162_s3 + $0x8] sm:$0xff]   ;;  %v769_v11 = vld [vmem:[%s1162_s3 + $0x10] sm:$0xff]   ;;  %v636_v19 = vcombine.low %v274_v6, %v274_v6  ;;  %687 = vmatprep.mubr.msk.bf16.mxu1 %vm892_vm1, %v891_v1  ;;  %s269_s24 = scalar_lea.vmem [#allocation5], %s633_s27  ;;  %vm517_vm2 = vcmask 80896   ;;  %s1110_s30 = scalar_lea.hbm %s1164_s5, %s658_s17 }
  0x3c   : > { %366 = vmatprep.subr.bf16.mxu0 %v890_v0  ;;  %672 = vmatpush3.bf16.msra.mxu1 %v767_v8  ;;  %v760_v10 = vld [vmem:[%s1161_s2 + $0x20] sm:$0xff]   ;;  %v761_v12 = vld [vmem:[%s1161_s2 + $0x28] sm:$0xff]   ;;  %v770_v13 = vld [vmem:[%s1162_s3 + $0x18] sm:$0xff]   ;;  %s271_s12 = scalar_select %p270_p8, %s879_s21, 1 }
  0x3d   : > { %647 = vmatprep.mubr.msk.bf16.mxu0 %vm360_vm0, %v637_v7  ;;  %673 = vmatprep.subr.bf16.mxu1 %v891_v1  ;;  %v762_v14 = vld [vmem:[%s1161_s2 + $0x30] sm:$0xff]   ;;  %v771_v15 = vld [vmem:[%s1162_s3 + $0x20] sm:$0xff]   ;;  %v763_v16 = vld [vmem:[%s1161_s2 + $0x38] sm:$0xff]   ;;  %s534_s28 = sshll.u32 %s269_s24, 4  ;;  %s520_s21 = scalar_lea.sflag [#allocation4], %s1035_s25  ;;  %s1112_s28 = int_to_ptr.vmem [resolvable:$true] %s534_s28 }
  0x3e   : > { %v772_v17 = vld [vmem:[%s1162_s3 + $0x28] sm:$0xff]   ;;  %v764_v18 = vld [vmem:[%s1161_s2 + $0x40] sm:$0xff]   ;;  %v773_v20 = vld [vmem:[%s1162_s3 + $0x30] sm:$0xff]   ;;  %s272_s29 = scalar_lea.vmem %s1159_s0, %s271_s12  ;;  %s805_s27 = scalar_lea.vmem %s1112_s28, 128 }
  0x3f   : > { %367 = vmatpush1.bf16.msra.mxu0 %v757_v3  ;;  %v774_v21 = vld [vmem:[%s1162_s3 + $0x38] sm:$0xff]   ;;  %v635_v22 = vld [vmem:[%s272_s29] ss:$0 sm:$0xff]  ;;  %p806_p9 = scmp.ne.s32.totalorder %s1112_s28, %s805_s27  ;;  %p1173_p11 = scmp.ne.s32.totalorder %s1168_s6, 0 }
  0x40   : > { %368 = vmatprep.subr.bf16.mxu0 %v890_v0  ;;  %674 = vmatpush3.bf16.msra.mxu1 %v768_v9  ;;  %v648_v30 = vld [vmem:[%s1163_s4] ss:$0 sm:$0xff]  ;;  %s893_s9 = smov [#allocation5]  }
  0x41   : > { %675 = vmatprep.subr.bf16.mxu1 %v891_v1  ;;  %p807_p0 = pnand %p806_p9, %p1173_p11  ;;  %s809_s12 = sshll.u32 %s893_s9, 4  ;;  %s810_s12 = int_to_ptr.vmem [resolvable:$false] %s809_s12 }
  0x42   : > { %s811_s13 = scalar_lea.vmem %s810_s12, 256  ;;  %p812_p13 = scmp.lt.s32.totalorder %s1112_s28, %s810_s12 }
  0x43   : > { %369 = vmatpush1.bf16.msra.mxu0 %v758_v4  ;;  %p808_p7 = pneg %p807_p0  ;;  %p813_p3 = scmp.lt.s32.totalorder %s811_s13, %s805_s27 }
  0x44   : > { %370 = vmatprep.subr.bf16.mxu0 %v890_v0  ;;  %676 = vmatpush3.bf16.msra.mxu1 %v769_v11 }
  0x45   : > { %677 = vmatprep.subr.bf16.mxu1 %v891_v1  ;;  %p814_p6 = por %p813_p3, %p812_p13 }
  0x47   : > { %371 = vmatpush1.bf16.msra.mxu0 %v759_v5  ;;  %p815_p4 = pnand %p814_p6, %p808_p7 }
  0x48   : > { %372 = vmatprep.subr.bf16.mxu0 %v890_v0  ;;  %678 = vmatpush3.bf16.msra.mxu1 %v770_v13 }
  0x49   : > { %679 = vmatprep.subr.bf16.mxu1 %v891_v1 }
  0x4b   : > { %373 = vmatpush1.bf16.msra.mxu0 %v760_v10 }
  0x4c   : > { %374 = vmatprep.subr.bf16.mxu0 %v890_v0  ;;  %680 = vmatpush3.bf16.msra.mxu1 %v771_v15 }
  0x4d   : > { %681 = vmatprep.subr.bf16.mxu1 %v891_v1 }
  0x4f   : > { %375 = vmatpush1.bf16.msra.mxu0 %v761_v12 }
  0x50   : > { %376 = vmatprep.subr.bf16.mxu0 %v890_v0  ;;  %682 = vmatpush3.bf16.msra.mxu1 %v772_v17 }
  0x51   : > { %683 = vmatprep.subr.bf16.mxu1 %v891_v1 }
  0x53   : > { %377 = vmatpush1.bf16.msra.mxu0 %v762_v14 }
  0x54   : > { %378 = vmatprep.subr.bf16.mxu0 %v890_v0  ;;  %684 = vmatpush3.bf16.msra.mxu1 %v773_v20 }
  0x55   : > { %685 = vmatprep.subr.bf16.mxu1 %v891_v1 }
  0x57   : > { %379 = vmatpush1.bf16.msra.mxu0 %v763_v16 }
  0x58   : > { %380 = vmatprep.subr.bf16.mxu0 %v890_v0  ;;  %686 = vmatpush3.bf16.msra.mxu1 %v774_v21 }
  0x5b   : > { %381 = vmatpush1.bf16.msra.mxu0 %v764_v18 }
  0x5e   : > { %397 = vmatmul.mubr.bf16.vlgmr.msra.gmra.mrb[0].mxu0 %v636_v19 }
 0x131   : > { %v398_v23 = vpop.f32.mrb[0].mxu0 }
 0x132   : > { %v399_v24 = vadd.f32 %v635_v22, %v398_v23  ;;  %v400_v25 = vpop.f32.mrb[1].mxu0 }
 0x133   : > { %v401_v26 = vpop.f32.mrb[2].mxu0 }
 0x134   : > { %v404_v27 = vmax.f32 %v399_v24, 0.0  ;;  %v402_v28 = vpop.f32.mrb[3].mxu0 }
 0x136   : > { %v405_v29 = vpack.c.bf16 %v404_v27, %v404_v27 }
 0x138   : > { %688 = vmatmul.mubr.bf16.vlgmr.msra.gmra.mrb[0].mxu1 %v405_v29 }
 0x20b   : > { %v511_v31 = vpop.f32.mrb[0].mxu1 }
 0x20c   : > { %v512_v32 = vadd.f32 %v648_v30, %v511_v31  ;;  %v689_v33 = vpop.f32.mrb[1].mxu1 }
 0x20d   : > { %v514_v34 = vpop.f32.mrb[2].mxu1 }
 0x20e   : > { %v690_v35 = vpop.f32.mrb[3].mxu1  ;;  %518 = vst.msk [vmem:[%s269_s24] sm:$0xff] %vm517_vm2, %v512_v32 }
 0x20f   : > { %818 = shalt.err (!%p815_p4)
}
 0x210   : > { %s819_s25 = scalar_lea.hbm %s1110_s30, 128  ;;  %s823_s14 = scalar_lea.hbm %s1164_s5, 256 }
 0x211   : > { %p820_p10 = scmp.ne.s32.totalorder %s1110_s30, %s819_s25  ;;  %p824_p2 = scmp.lt.u32.totalorder %s1110_s30, %s1164_s5 }
 0x212   : > { %p825_p5 = scmp.lt.u32.totalorder %s823_s14, %s819_s25  ;;  %p827_p9 = scmp.lt.u32.totalorder %s819_s25, %s1110_s30 }
 0x213   : > { %p821_p12 = pnand %p820_p10, %p1173_p11 }
 0x214   : > { %p826_p8 = por %p825_p5, %p824_p2 }
 0x215   : > { %p822_p1 = pneg %p821_p12 }
 0x216   : > { %p828_p0 = por %p827_p9, %p826_p8 }
 0x218   : > { %p829_p7 = pnand %p828_p0, %p822_p1 }
 0x21a   : > { %832 = shalt.err (!%p829_p7)
}
 0x21b   : > { %693 = dma.vmem_to_hbm [thread:$0]  (%p1173_p11), %s1112_s28, 128, %s1110_s30, %s520_s21  }
 0x21c PF: > { %s546_s24 = sand.u32 1, %s867_s18   ;;  %p1174_p13 = scmp.ne.s32.totalorder %s1169_s8, 0 }
 0x21d   : > { %p1175_p3 = scmp.ge.s32.totalorder %s887_s23, 2  ;;  %s547_s10 = scalar_lea.sflag [#allocation4], %s546_s24 }
 0x21f   : > { %p700_p6 = pnand %p1175_p3, %p1174_p13 }
 0x221   : > { %862 = dma.done.wait (!%p700_p6), %s547_s10, 128  }
 0x222   : > { %864 = vsyncadd (!%p700_p6), %s547_s10, 4294967168  ;;  %s21_s23 = sadd.s32 1, %s887_s23   ;;  %s1176_s18 = smov %s871_s19 }
 0x223   : > { %p18_p4 = scmp.ge.s32.totalorder %s21_s23, 4   ;;  %s1177_s19 = smov %s875_s20 }
 0x224   : > { %s1178_s20 = smov %s980_s7  ;;  %s1179_s21 = smov %s883_s22 }
 0x225   : > { %s1180_s22 = smov %s1182_s26  ;;  %20 = sbr.rel (!%p18_p4) target bundleno = 6 (0x6), region = 88 }
 0x22c   :  { %552 = vsyncpa [#allocation3], 1 }
 0x22d   :  { %554 = vsyncpa [#allocation3 + $0x1], 1 }
 0x22e   :  { %555 = vsyncpa [#allocation4], 1 }
 0x22f   :  { %557 = vsyncpa [#allocation4 + $0x1], 1 }

</bundles_post_ra>
